<compile_context>
chip_gen: v7x
topology: tpu7x:2x2x1
jax: 0.10.0
libtpu: 0.0.40
codegen_flags: <defaults>
</compile_context>

<pallas_src>
import jax
import jax.numpy as jnp
from jax.experimental import pallas as pl
from jax.experimental.pallas import tpu as pltpu


def _round_up(n, m):
    return ((n + m - 1) // m) * m


def _cdiv(a, b):
    return -(-a // b)


_VMEM_BLOCK_BUDGET = 24 * 1024 * 1024   # budget for double-buffered in+out blocks
_VMEM_LIMIT_BYTES = 32 * 1024 * 1024    # explicit scoped-VMEM limit (<= v7x 64 MiB physical)


def _make_corr2d_kernel(kh, kw, rows, wp):
    """Kernel closed over the static tap geometry and the (rows, wp) tile shape."""

    def kernel(x_ref, w_ref, b_ref, o_ref):
        # x_ref : VMEM (rows, wp) f32  -- B plane-groups stacked along sublanes
        # w_ref : SMEM (kh*kw,)   f32  -- flattened taps (scalar reads)
        # b_ref : SMEM (1,)       f32
        # o_ref : VMEM (rows, wp) f32  -- lane-dense output (valid region sliced outside)
        x_t = x_ref[...]
        # Two partial accumulators restore ILP on the VALU (tree accumulation).
        acc = [None, None]
        t = 0
        for di in range(kh):
            # Sublane roll for the row offset (skipped entirely when di == 0).
            # TODO(synk): on v6e/v7x with large kh, replace these axis-0 rolls with
            # sublane-offset loads (needs a per-plane row-halo layout, not the
            # flattened sublane stacking used here).
            x_r = x_t if di == 0 else pltpu.roll(x_t, shift=rows - di, axis=0)
            for dj in range(kw):
                # Lane roll: rolled[:, j] == x[:, j + dj] for all valid columns.
                tap = x_r if dj == 0 else pltpu.roll(x_r, shift=wp - dj, axis=1)
                contrib = tap * w_ref[t]
                s = t & 1
                acc[s] = contrib if acc[s] is None else acc[s] + contrib
                t += 1
        total = acc[0] if acc[1] is None else acc[0] + acc[1]
        o_ref[...] = (total + b_ref[0]).astype(o_ref.dtype)

    return kernel


def conv2d_forward_batched(x, weight, bias):
    """corr2d(x[n], weight) + bias for a batch of planes, one pallas_call."""
    n, h, w = x.shape
    kh, kw = weight.shape
    oh, ow = h - kh + 1, w - kw + 1
    if oh <= 0 or ow <= 0:
        raise ValueError(f"filter {(kh, kw)} larger than input plane {(h, w)}")

    # Cast only when needed (avoid redundant convert ops in front of the kernel).
    xf = x if x.dtype == jnp.float32 else x.astype(jnp.float32)
    wf = weight if weight.dtype == jnp.float32 else weight.astype(jnp.float32)
    bf = bias if bias.dtype == jnp.float32 else bias.astype(jnp.float32)

    # ---- Lane packing: put g planes side by side along the 128-lane axis. ----
    gmax = max(1, 128 // w)
    ng = _cdiv(n, gmax)          # number of packed plane-groups
    g = _cdiv(n, ng)             # balanced pack factor (<= gmax, minimizes batch padding)

    hp = _round_up(h, 8)         # padded rows per plane-group (sublane multiple)
    wp = _round_up(g * w, 128)   # padded lanes per plane-group (lane multiple)

    # ---- Plane-group blocking: B groups per grid step, sized against VMEM. ----
    # Double-buffered f32 in+out per group = 16 * hp * wp bytes.
    b_vmem = max(1, _VMEM_BLOCK_BUDGET // (16 * hp * wp))
    # Aim for ~8 grid steps (pipeline overlap on 1-TC chips) and always >=2 steps
    # when there is more than one group (v7x megacore split).
    b = max(1, min(b_vmem, _cdiv(ng, 8)))
    steps = _cdiv(ng, b)
    ng_pad = steps * b
    n_pad = ng_pad * g

    # ---- Build the packed, padded, flattened input slab. ----
    xb = xf if n_pad == n else jnp.pad(xf, ((0, n_pad - n), (0, 0), (0, 0)))
    xpk = xb.reshape(ng_pad, g, h, w).transpose(0, 2, 1, 3).reshape(ng_pad, h, g * w)
    if (hp, wp) != (h, g * w):
        xpk = jnp.pad(xpk, ((0, 0), (0, hp - h), (0, wp - g * w)))
    # Stack plane-groups along the sublane axis -> contiguous 2-D slab (free reshape).
    x2d = xpk.reshape(ng_pad * hp, wp)
    # TODO(synk): for large planes, avoid these wrapper pad/pack HBM passes by
    # consuming a padded output layout or DMA-ing unpadded planes with
    # memory_space=pl.ANY + pltpu.make_async_copy.
    # TODO(synk): add a row-tiled grid with a (kh-1)-row halo once a single
    # plane-group block no longer fits the VMEM budget.

    w_flat = wf.reshape(kh * kw)
    rows = b * hp

    cost = pl.CostEstimate(
        flops=2 * n * oh * ow * kh * kw,
        transcendentals=0,
        bytes_accessed=4 * (2 * ng_pad * hp * wp + kh * kw + 1),
    )

    out2d = pl.pallas_call(
        _make_corr2d_kernel(kh, kw, rows, wp),
        out_shape=jax.ShapeDtypeStruct((ng_pad * hp, wp), jnp.float32),
        grid=(steps,),
        in_specs=[
            pl.BlockSpec((rows, wp), lambda i: (i, 0)),   # B plane-groups per step
            pl.BlockSpec(memory_space=pltpu.SMEM),        # flattened taps
            pl.BlockSpec(memory_space=pltpu.SMEM),        # bias scalar
        ],
        out_specs=pl.BlockSpec((rows, wp), lambda i: (i, 0)),
        compiler_params=pltpu.CompilerParams(
            dimension_semantics=("parallel",),
            vmem_limit_bytes=_VMEM_LIMIT_BYTES,
        ),
        cost_estimate=cost,
    )(x2d, w_flat, bf)

    # ---- Slice the valid region and unpack lanes back into planes. ----
    out3 = out2d.reshape(ng_pad, hp, wp)
    out = out3[:, :oh, :g * w].reshape(ng_pad, oh, g, w)[:, :, :, :ow]
    out = out.transpose(0, 2, 1, 3).reshape(ng_pad * g, oh, ow)
    return out[:n]


def conv2d_forward(x, weight, bias):
    """Pallas equivalent of Conv2D.forward on a single 2-D plane."""
    return conv2d_forward_batched(x[None], weight, bias)[0]


def corr2d_ref(x, k):
    """Pure-JAX reference mirroring the PyTorch corr2d loop."""
    kh, kw = k.shape
    oh, ow = x.shape[0] - kh + 1, x.shape[1] - kw + 1
    out = jnp.zeros((oh, ow), jnp.float32)
    for di in range(kh):
        for dj in range(kw):
            out = out + x[di:di + oh, dj:dj + ow] * k[di, dj]
    return out


if __name__ == "__main__":
    key = jax.random.PRNGKey(0)
    k_w, k_b, k_x, k_w2, k_x2 = jax.random.split(key, 5)

    # Shapes consistent with the module/script: x = (6, 8), kernel_size = (1, 2).
    x = jnp.ones((6, 8), dtype=jnp.float32)
    weight = jax.random.normal(k_w, (1, 2), dtype=jnp.float32)  # nn.Parameter(torch.randn(kernel_size))
    bias = jax.random.normal(k_b, (1,), dtype=jnp.float32)      # nn.Parameter(torch.randn(1))

    # Single-plane forward (the module's actual contract).
    y = jax.block_until_ready(conv2d_forward(x, weight, bias))
    y_ref = corr2d_ref(x, weight) + bias[0]
    assert y.shape == (6, 7), y.shape
    assert jnp.allclose(y, y_ref, atol=1e-5, rtol=1e-5), "mismatch vs reference (single plane)"

    # Batched small-W planes exercise lane packing (4 planes share one lane group).
    xb = jax.random.normal(k_x, (4, 6, 8), dtype=jnp.float32)
    yb = jax.block_until_ready(conv2d_forward_batched(xb, weight, bias))
    yb_ref = jnp.stack([corr2d_ref(xb[i], weight) + bias[0] for i in range(xb.shape[0])])
    assert yb.shape == (4, 6, 7), yb.shape
    assert jnp.allclose(yb, yb_ref, atol=1e-5, rtol=1e-5), "mismatch vs reference (batched 1x2)"

    # A 3x3 filter exercises the sublane (row) taps and the lane-pack boundaries.
    w3 = jax.random.normal(k_w2, (3, 3), dtype=jnp.float32)
    x3 = jax.random.normal(k_x2, (5, 12, 20), dtype=jnp.float32)
    y3 = jax.block_until_ready(conv2d_forward_batched(x3, w3, bias))
    y3_ref = jnp.stack([corr2d_ref(x3[i], w3) + bias[0] for i in range(x3.shape[0])])
    assert y3.shape == (5, 10, 18), y3.shape
    assert jnp.allclose(y3, y3_ref, atol=1e-4, rtol=1e-4), "mismatch vs reference (batched 3x3)"

    print("KERNEL_OK")
</pallas_src>

<mosaic_0001>
module attributes {stable_mosaic.version = 11 : i64} {
  func.func @kernel(%arg0: i32, %arg1: memref<8x128xf32, #tpu.memory_space<vmem>>, %arg2: memref<2xf32, #tpu.memory_space<smem>>, %arg3: memref<1xf32, #tpu.memory_space<smem>>, %arg4: memref<8x128xf32, #tpu.memory_space<vmem>>) attributes {dimension_semantics = [#tpu.dimension_semantics<parallel>], iteration_bounds = array<i64: 1>, scalar_prefetch = 0 : i64, scratch_operands = 0 : i64, tpu.core_type = #tpu.core_type<tc>, window_params = [{transform_indices = @transform_0, window_bounds = array<i64: 8, 128>}, {transform_indices = @transform_1, window_bounds = array<i64: 2>}, {transform_indices = @transform_2, window_bounds = array<i64: 1>}, {transform_indices = @transform_3, window_bounds = array<i64: 8, 128>}]} {
    %c0 = arith.constant 0 : index
    %c0_0 = arith.constant 0 : index
    %0 = vector.load %arg1[%c0, %c0_0] : memref<8x128xf32, #tpu.memory_space<vmem>>, vector<8x128xf32>
    %c0_1 = arith.constant 0 : index
    %1 = memref.load %arg2[%c0_1] : memref<2xf32, #tpu.memory_space<smem>>
    %2 = vector.broadcast %1 : f32 to vector<8x128xf32>
    %3 = arith.mulf %0, %2 : vector<8x128xf32>
    %c127_i32 = arith.constant 127 : i32
    %4 = tpu.dynamic_rotate %0 by %c127_i32 dim 1 : vector<8x128xf32>, i32 -> vector<8x128xf32>
    %c1 = arith.constant 1 : index
    %5 = memref.load %arg2[%c1] : memref<2xf32, #tpu.memory_space<smem>>
    %6 = vector.broadcast %5 : f32 to vector<8x128xf32>
    %7 = arith.mulf %4, %6 : vector<8x128xf32>
    %8 = arith.addf %3, %7 : vector<8x128xf32>
    %c0_2 = arith.constant 0 : index
    %9 = memref.load %arg3[%c0_2] : memref<1xf32, #tpu.memory_space<smem>>
    %10 = vector.broadcast %9 : f32 to vector<8x128xf32>
    %11 = arith.addf %8, %10 : vector<8x128xf32>
    %c0_3 = arith.constant 0 : index
    %c0_4 = arith.constant 0 : index
    %12 = vector.load %arg4[%c0_3, %c0_4] : memref<8x128xf32, #tpu.memory_space<vmem>>, vector<8x128xf32>
    tpu.vector_store %arg4[%c0_3, %c0_4], %11 {strides = array<i32>} : memref<8x128xf32, #tpu.memory_space<vmem>>, vector<8x128xf32>,
    return
  }
  func.func @transform_0(%arg0: i32) -> (i32, i32) {
    %c0_i32 = arith.constant 0 : i32
    %c0_i32_0 = arith.constant 0 : i32
    return %arg0, %c0_i32 : i32, i32
  }
  func.func @transform_1(%arg0: i32) -> i32 {
    %c0_i32 = arith.constant 0 : i32
    %c0_i32_0 = arith.constant 0 : i32
    return %c0_i32 : i32
  }
  func.func @transform_2(%arg0: i32) -> i32 {
    %c0_i32 = arith.constant 0 : i32
    %c0_i32_0 = arith.constant 0 : i32
    return %c0_i32 : i32
  }
  func.func @transform_3(%arg0: i32) -> (i32, i32) {
    %c0_i32 = arith.constant 0 : i32
    %c0_i32_0 = arith.constant 0 : i32
    return %arg0, %c0_i32 : i32, i32
  }
}

</mosaic_0001>

<bundles_post_ra>
// kernel: tpu_custom_call.1
= control target key start
LH: loop header
LB: loop body
LE: loop exit
PB: predicated region body
PF: predicated region fallthrough
CT: control target
= control target key end

     0   :  { %9 = vsyncpa [#allocation4], 0  ;;  %s192_s0 = inlined_call_operand.hbm [shape: f32[8,128], index: 0, kind: input, shape index: {}]   ;;  %s193_s1 = inlined_call_operand.vmem [shape: f32[2], index: 1, kind: input, shape index: {}]   ;;  %s194_s2 = inlined_call_operand.<no memory space> [shape: f32[1], index: 2, kind: input, shape index: {}]   ;;  %s195_s3 = inlined_call_operand.hbm [shape: f32[8,128], index: 3, kind: output, shape index: {}]  }
   0x1   :  { %10 = vsyncpa [#allocation6], 0 }
   0x2   :  { %11 = vsyncpa [#allocation5], 0  ;;  %s28_s14 = sshll.u32 %s193_s1, 4  ;;  %s138_s15 = smov [#allocation3]   ;;  %s29_s14 = int_to_ptr.vmem [resolvable:$true] %s28_s14 }
   0x3   :  { %s18_s16 = sshll.u32 %s138_s15, 4  ;;  %s76_s19 = scalar_lea.hbm %s192_s0, 128  ;;  %s19_s16 = int_to_ptr.vmem [resolvable:$true] %s18_s16 }
   0x4   :  { %p77_p0 = scmp.ne.s32.totalorder %s192_s0, %s76_s19  ;;  %p80_p1 = scmp.lt.u32.totalorder %s76_s19, %s192_s0 }
   0x6   :  { %p82_p2 = pnand %p80_p1, %p77_p0 }
   0x8   :  { %85 = shalt.err (!%p82_p2)
}
   0x9   :  { %s86_s24 = scalar_lea.vmem %s19_s16, 128  ;;  %p91_p4 = scmp.lt.s32.totalorder %s19_s16, %s19_s16 }
   0xa   :  { %p87_p3 = scmp.ne.s32.totalorder %s19_s16, %s86_s24  ;;  %p92_p5 = scmp.lt.s32.totalorder %s86_s24, %s86_s24 }
   0xc   :  { %p93_p6 = por %p92_p5, %p91_p4 }
   0xe   :  { %p94_p7 = pnand %p93_p6, %p87_p3 }
  0x10   :  { %97 = shalt.err (!%p94_p7)
}
  0x11   :  { %21 = dma.hbm_to_vmem [thread:$0]  %s192_s0, 128, %s19_s16, [#allocation4]  }
  0x12   :  { %s98_s26 = scalar_lea.vmem %s29_s14, 16  ;;  %p103_p9 = scmp.lt.s32.totalorder %s29_s14, %s29_s14 }
  0x13   :  { %p99_p8 = scmp.ne.s32.totalorder %s29_s14, %s98_s26  ;;  %p104_p10 = scmp.lt.s32.totalorder %s98_s26, %s98_s26 }
  0x15   :  { %p105_p11 = por %p104_p10, %p103_p9 }
  0x17   :  { %p106_p12 = pnand %p105_p11, %p99_p8 }
  0x19   :  { %109 = shalt.err (!%p106_p12)
}
  0x1a   :  { %s139_s27 = smov [#allocation7]  }
  0x1b   :  { %31 = dma.vmem_to_smem %s29_s14, 16, %s139_s27, [#allocation6]  }
  0x1c   :  { %132 = dma.done.wait [#allocation4], 128  }
  0x1d   :  { %133 = vsyncadd [#allocation4], 4294967168 }
  0x1e   :  { %134 = dma.done.wait [#allocation6], 16  }
  0x1f   :  { %135 = vsyncadd [#allocation6], 4294967280 }
  0x20   :  { %40 = sfence }
  0x21   :  { %v41_v0 = vld [vmem:[#allocation3] sm:$0xff]  ;;  %s140_s28 = smov 127   ;;  %s42_s29 = sld [smem:[#allocation7]]  ;;  %v52_v6 = vstv %s194_s2 }
  0x22   :  { %45 = vrot.lane.b32.xlu0 %v41_v0, %s140_s28  ;;  %s71_s30 = sld [smem:[#allocation7 + $0x1]]  ;;  %s141_s5 = smov [#allocation8]  }
  0x23   :  { %s61_s6 = sshll.u32 %s141_s5, 4  ;;  %s62_s6 = int_to_ptr.vmem [resolvable:$true] %s61_s6 }
  0x24   :  { %s110_s7 = scalar_lea.vmem %s62_s6, 128  ;;  %p115_p0 = scmp.lt.s32.totalorder %s62_s6, %s62_s6 }
  0x25   :  { %p111_p13 = scmp.ne.s32.totalorder %s62_s6, %s110_s7  ;;  %p116_p1 = scmp.lt.s32.totalorder %s110_s7, %s110_s7 }
  0x27   :  { %v43_v1 = vstv %s42_s29  ;;  %p117_p2 = por %p116_p1, %p115_p0 }
  0x28   :  { %v48_v2 = vstv %s71_s30  ;;  %v44_v3 = vmul.f32 %v43_v1, %v41_v0 }
  0x29   :  { %p118_p3 = pnand %p117_p2, %p111_p13 }
  0x94   :  { %v46_v4 = vpop.permute.xlu0 %45 }
  0x95   :  { %v49_v5 = vmul.f32 %v48_v2, %v46_v4 }
  0x97   :  { %v50_v7 = vadd.f32 %v49_v5, %v44_v3 }
  0x99   :  { %v53_v8 = vadd.f32 %v52_v6, %v50_v7 }
  0x9b   :  { %54 = vst [vmem:[#allocation8] sm:$0xff] %v53_v8 }
  0x9c   :  { %121 = shalt.err (!%p118_p3)
}
  0x9d   :  { %s122_s10 = scalar_lea.hbm %s195_s3, 128 }
  0x9e   :  { %p123_p4 = scmp.ne.s32.totalorder %s195_s3, %s122_s10  ;;  %p126_p5 = scmp.lt.u32.totalorder %s122_s10, %s195_s3 }
  0xa0   :  { %p128_p6 = pnand %p126_p5, %p123_p4 }
  0xa2   :  { %131 = shalt.err (!%p128_p6)
}
  0xa3   :  { %64 = dma.vmem_to_hbm [thread:$0]  %s62_s6, 128, %s195_s3, [#allocation5]  }
  0xa4   :  { %136 = dma.done.wait [#allocation5], 128  }
  0xa5   :  { %137 = vsyncadd [#allocation5], 4294967168 }
  0xa6   :  { %68 = vsyncpa [#allocation4], 1 }
  0xa7   :  { %69 = vsyncpa [#allocation5], 1 }
  0xa8   :  { %70 = vsyncpa [#allocation6], 1 }

</bundles_post_ra>
